<compile_context>
chip_gen: v7x
topology: tpu7x:2x2x1
jax: 0.10.0
libtpu: 0.0.40
codegen_flags: <defaults>
</compile_context>

<pallas_src>
import functools

import jax
import jax.numpy as jnp
from jax import lax
from jax.experimental import pallas as pl
from jax.experimental.pallas import tpu as pltpu


def _round_up(v, m):
    return (v + m - 1) // m * m


def _phase_taps(ksize, stride, pad):
    """For each output phase r in [0, stride): list of (tap k, input offset delta)
    such that out[stride*q + r] += x[q + delta] * w[k] (x read as 0 outside range)."""
    phases = []
    for r in range(stride):
        taps = []
        for k in range(ksize):
            if (r + pad - k) % stride == 0:
                taps.append((k, (r + pad - k) // stride))
        phases.append(taps)
    return phases


def _ccT_kernel(cols_ref, w_ref, b_ref, o_ref):
    """One fused complex matmul per (batch, phase, spatial-tile) grid step.

    cols_ref: (1, 1, Kpad, T)     bf16  per-phase im2col columns (rows: tap-major, chan-minor)
    w_ref   : (1, C2o_pad, Kpad)  bf16  per-phase stacked complex weight [[Wr,-Wi],[Wi,Wr]]
    b_ref   : (C2o_pad, 1)        f32   combined bias rows [br - bi | br + bi | 0 ...]
    o_ref   : (1, 1, C2o_pad, T)  f32   channels in sublanes, spatial in lanes (lane-dense)
    """
    acc = jnp.dot(w_ref[0, :, :], cols_ref[0, 0, :, :],
                  preferred_element_type=jnp.float32)
    # single store; bias folded into the same pass (one cheap VPU add on the result)
    o_ref[0, 0, :, :] = acc + b_ref[...]


def complex_conv_transpose2d(x, wr, wi, br, bi, *, kernel_size,
                             stride=(1, 1), padding=(0, 0),
                             output_padding=(0, 0)):
    """Pallas forward of ComplexConvTranspose2d (complex_axis=1, groups=1).

    x      : (N, 2*Ci, Hin, Win) f32, channels ordered [real..., imag...]
    wr, wi : (Ci, Co, kh, kw)    PyTorch ConvTranspose2d weight layout
    br, bi : (Co,)
    returns: (N, 2*Co, Hout, Wout) f32, channels ordered [real..., imag...]
    """
    kh, kw = kernel_size
    sh, sw = stride
    ph, pw = padding
    oph, opw = output_padding
    assert oph < sh and opw < sw, "PyTorch requires output_padding < stride"

    N, C2, Hin, Win = x.shape
    Ci = C2 // 2
    Co = wr.shape[1]
    C2o = 2 * Co
    Hout = (Hin - 1) * sh - 2 * ph + kh + oph
    Wout = (Win - 1) * sw - 2 * pw + kw + opw
    assert Hout > 0 and Wout > 0

    # ------------------ stride-phase decomposition bookkeeping ------------------
    taps_h = _phase_taps(kh, sh, ph)
    taps_w = _phase_taps(kw, sw, pw)
    Hq = -(-Hout // sh)                      # padded per-phase output rows (ceil)
    Wq = -(-Wout // sw)
    n_ph = sh * sw

    all_dh = [d for t in taps_h for _, d in t] or [0]
    all_dw = [d for t in taps_w for _, d in t] or [0]
    lo_h = max(0, -min(all_dh))
    hi_h = max(0, Hq - 1 + max(all_dh) - (Hin - 1))
    lo_w = max(0, -min(all_dw))
    hi_w = max(0, Wq - 1 + max(all_dw) - (Win - 1))

    Kmax = max(len(t) for t in taps_h) * max(len(t) for t in taps_w) * C2
    Kpad = _round_up(max(Kmax, 1), 8)        # contraction dim (sublanes of cols)
    C2o_pad = _round_up(C2o, 8)              # output channels -> sublanes (no 128 pad)

    HWq = Hq * Wq
    # Spatial lane tile: multiple of 128, sized so (bf16 cols + f32 out) per block
    # stays ~4 MiB (double-buffered it is safe on v5e..v7x) while amortizing the
    # per-grid-step overhead.
    bytes_per_col = Kpad * 2 + C2o_pad * 4
    t_budget = max(128, ((4 * 1024 * 1024) // bytes_per_col) // 128 * 128)
    T = min(_round_up(HWq, 128), t_budget)
    HWq_pad = _round_up(HWq, T)

    # ------------- im2col on the COMPACT input (no dilation zeros) --------------
    x_p = jnp.pad(x, ((0, 0), (0, 0), (lo_h, hi_h), (lo_w, hi_w))).astype(jnp.bfloat16)

    # stacked complex weight per tap: rows = [real_out | imag_out], cols = [real_in | imag_in]
    wrT = jnp.transpose(wr, (1, 0, 2, 3))    # (Co, Ci, kh, kw)
    wiT = jnp.transpose(wi, (1, 0, 2, 3))
    wc_full = jnp.concatenate(
        [jnp.concatenate([wrT, -wiT], axis=1),
         jnp.concatenate([wiT,  wrT], axis=1)], axis=0)      # (2Co, 2Ci, kh, kw)

    cols_ph_list, w_ph_list = [], []
    for rh in range(sh):
        for rw in range(sw):
            pairs = [(ki, dh, kj, dw) for ki, dh in taps_h[rh] for kj, dw in taps_w[rw]]
            if pairs:
                chunks, wcols = [], []
                for ki, dh, kj, dw in pairs:
                    h0, w0 = lo_h + dh, lo_w + dw
                    chunks.append(x_p[:, :, h0:h0 + Hq, w0:w0 + Wq])   # (N, 2Ci, Hq, Wq)
                    wcols.append(wc_full[:, :, ki, kj])                # (2Co, 2Ci)
                cols = jnp.concatenate(chunks, axis=1).reshape(N, len(pairs) * C2, HWq)
                wmat = jnp.concatenate(wcols, axis=1)                  # (2Co, taps*2Ci)
            else:   # phase gets no taps (kernel smaller than stride): bias only
                cols = jnp.zeros((N, 0, HWq), jnp.bfloat16)
                wmat = jnp.zeros((C2o, 0), wr.dtype)
            cols_ph_list.append(jnp.pad(
                cols, ((0, 0), (0, Kpad - cols.shape[1]), (0, HWq_pad - HWq))))
            w_ph_list.append(jnp.pad(
                wmat, ((0, C2o_pad - C2o), (0, Kpad - wmat.shape[1]))))

    cols_all = jnp.stack(cols_ph_list, axis=1)                   # (N, n_ph, Kpad, HWq_pad) bf16
    w_all = jnp.stack(w_ph_list, axis=0).astype(jnp.bfloat16)    # (n_ph, C2o_pad, Kpad)
    # bias of the two convs combines as: real += (br - bi), imag += (br + bi)
    bias = jnp.concatenate([br - bi, br + bi]).astype(jnp.float32)
    bias = jnp.pad(bias, (0, C2o_pad - C2o)).reshape(C2o_pad, 1)

    grid = (N, n_ph, HWq_pad // T)
    out_ph = pl.pallas_call(
        _ccT_kernel,
        out_shape=jax.ShapeDtypeStruct((N, n_ph, C2o_pad, HWq_pad), jnp.float32),
        grid_spec=pltpu.PrefetchScalarGridSpec(
            num_scalar_prefetch=0,
            grid=grid,
            in_specs=[
                pl.BlockSpec((1, 1, Kpad, T), lambda n, p, t: (n, p, 0, t)),
                # weight depends only on the phase axis, bias is grid-invariant ->
                # the pipeline keeps them resident instead of re-DMAing per step.
                pl.BlockSpec((1, C2o_pad, Kpad), lambda n, p, t: (p, 0, 0)),
                pl.BlockSpec((C2o_pad, 1), lambda n, p, t: (0, 0)),
            ],
            out_specs=pl.BlockSpec((1, 1, C2o_pad, T), lambda n, p, t: (n, p, 0, t)),
        ),
        compiler_params=pltpu.CompilerParams(
            dimension_semantics=("parallel", "parallel", "parallel"),
            vmem_limit_bytes=32 * 1024 * 1024,     # blocks are tiny; safe v5e..v7x
        ),
    )(cols_all, w_all, bias)

    # -------- phase interleave (depth-to-space) back to NCHW, crop padding ------
    out_ph = out_ph[:, :, :C2o, :HWq].reshape(N, sh, sw, C2o, Hq, Wq)
    out = jnp.transpose(out_ph, (0, 3, 4, 1, 5, 2)).reshape(N, C2o, Hq * sh, Wq * sw)
    return out[:, :, :Hout, :Wout]


def _ref_forward(x, wr, wi, br, bi, *, kernel_size, stride, padding, output_padding):
    """Pure-JAX reference matching the PyTorch module (for verification)."""
    kh, kw = kernel_size
    sh, sw = stride
    ph, pw = padding
    oph, opw = output_padding
    Ci = x.shape[1] // 2
    xr, xi = x[:, :Ci], x[:, Ci:]

    def convT(inp, w, b):
        wf = jnp.flip(w, axis=(2, 3)).transpose(1, 0, 2, 3)   # (Co, Ci, kh, kw) OIHW
        o = lax.conv_general_dilated(
            inp, wf, window_strides=(1, 1),
            padding=[(kh - 1 - ph, kh - 1 - ph + oph),
                     (kw - 1 - pw, kw - 1 - pw + opw)],
            lhs_dilation=(sh, sw), rhs_dilation=(1, 1),
            dimension_numbers=("NCHW", "OIHW", "NCHW"))
        return o + b[None, :, None, None]

    r2r = convT(xr, wr, br)
    i2i = convT(xi, wi, bi)
    r2i = convT(xr, wi, bi)
    i2r = convT(xi, wr, br)
    return jnp.concatenate([r2r - i2i, r2i + i2r], axis=1)


if __name__ == "__main__":
    # ComplexConvTranspose2d(4, 8, kernel_size=(3,3), stride=(2,2),
    #                        padding=(1,1), output_padding=(1,1))
    in_channels, out_channels = 4, 8
    kernel_size = (3, 3)
    stride = (2, 2)
    padding = (1, 1)
    output_padding = (1, 1)

    ci, co = in_channels // 2, out_channels // 2
    key = jax.random.PRNGKey(0)
    kx, kwr, kwi, kbr, kbi = jax.random.split(key, 5)

    x = jax.random.normal(kx, (2, in_channels, 16, 16), dtype=jnp.float32)
    # Weights: nn.init.normal_(std=0.05). Biases are zero-initialised in the module;
    # small non-zero values here exercise the bias combination.
    wr = 0.05 * jax.random.normal(kwr, (ci, co) + kernel_size, dtype=jnp.float32)
    wi = 0.05 * jax.random.normal(kwi, (ci, co) + kernel_size, dtype=jnp.float32)
    br = 0.05 * jax.random.normal(kbr, (co,), dtype=jnp.float32)
    bi = 0.05 * jax.random.normal(kbi, (co,), dtype=jnp.float32)

    fwd = jax.jit(functools.partial(
        complex_conv_transpose2d, kernel_size=kernel_size, stride=stride,
        padding=padding, output_padding=output_padding))
    out = jax.block_until_ready(fwd(x, wr, wi, br, bi))

    ref = jax.block_until_ready(_ref_forward(
        x, wr, wi, br, bi, kernel_size=kernel_size, stride=stride,
        padding=padding, output_padding=output_padding))

    assert out.shape == ref.shape == (2, out_channels, 32, 32), (out.shape, ref.shape)
    max_err = float(jnp.max(jnp.abs(out - ref)))
    # bf16 MXU operands with f32 accumulation -> loose-ish tolerance
    assert jnp.allclose(out, ref, atol=2e-2, rtol=2e-2), max_err
    print("KERNEL_OK")
</pallas_src>

<mosaic_0001>
module attributes {stable_mosaic.version = 11 : i64} {
  func.func @_ccT_kernel(%arg0: i32, %arg1: i32, %arg2: i32, %arg3: memref<1x1x16x256xbf16, #tpu.memory_space<vmem>>, %arg4: memref<1x8x16xbf16, #tpu.memory_space<vmem>>, %arg5: memref<8x1xf32, #tpu.memory_space<vmem>>, %arg6: memref<1x1x8x256xf32, #tpu.memory_space<vmem>>) attributes {dimension_semantics = [#tpu.dimension_semantics<parallel>, #tpu.dimension_semantics<parallel>, #tpu.dimension_semantics<parallel>], iteration_bounds = array<i64: 2, 4, 1>, scalar_prefetch = 0 : i64, scratch_operands = 0 : i64, tpu.core_type = #tpu.core_type<tc>, window_params = [{transform_indices = @transform_0, window_bounds = array<i64: 1, 1, 16, 256>}, {transform_indices = @transform_1, window_bounds = array<i64: 1, 8, 16>}, {pipeline_mode = #tpu.pipeline_mode<synchronous>, transform_indices = @transform_2, window_bounds = array<i64: 8, 1>}, {transform_indices = @transform_3, window_bounds = array<i64: 1, 1, 8, 256>}]} {
    %c0 = arith.constant 0 : index
    %c0_0 = arith.constant 0 : index
    %c0_1 = arith.constant 0 : index
    %0 = vector.load %arg4[%c0, %c0_0, %c0_1] : memref<1x8x16xbf16, #tpu.memory_space<vmem>>, vector<1x8x16xbf16>
    %1 = vector.shape_cast %0 : vector<1x8x16xbf16> to vector<8x16xbf16>
    %c0_2 = arith.constant 0 : index
    %c0_3 = arith.constant 0 : index
    %c0_4 = arith.constant 0 : index
    %c0_5 = arith.constant 0 : index
    %2 = vector.load %arg3[%c0_2, %c0_3, %c0_4, %c0_5] : memref<1x1x16x256xbf16, #tpu.memory_space<vmem>>, vector<1x1x16x256xbf16>
    %3 = vector.shape_cast %2 : vector<1x1x16x256xbf16> to vector<16x256xbf16>
    %cst = arith.constant dense<0.000000e+00> : vector<8x256xf32>
    %4 = tpu.matmul %1, %3, %cst {dimension_numbers = #tpu.dot_dimension_numbers<[1], [0], [0], [1], [0, 0, 1, 1], [], []>} : vector<8x16xbf16>, vector<16x256xbf16>, vector<8x256xf32> -> vector<8x256xf32>
    %c0_6 = arith.constant 0 : index
    %c0_7 = arith.constant 0 : index
    %5 = vector.load %arg5[%c0_6, %c0_7] : memref<8x1xf32, #tpu.memory_space<vmem>>, vector<8x1xf32>
    %6 = vector.broadcast %5 : vector<8x1xf32> to vector<8x256xf32>
    %7 = arith.addf %4, %6 : vector<8x256xf32>
    %c0_8 = arith.constant 0 : index
    %c0_9 = arith.constant 0 : index
    %c0_10 = arith.constant 0 : index
    %c0_11 = arith.constant 0 : index
    %8 = vector.load %arg6[%c0_8, %c0_9, %c0_10, %c0_11] : memref<1x1x8x256xf32, #tpu.memory_space<vmem>>, vector<1x1x8x256xf32>
    %9 = vector.shape_cast %8 : vector<1x1x8x256xf32> to vector<8x256xf32>
    %10 = vector.shape_cast %7 : vector<8x256xf32> to vector<1x1x8x256xf32>
    tpu.vector_store %arg6[%c0_8, %c0_9, %c0_10, %c0_11], %10 {strides = array<i32>} : memref<1x1x8x256xf32, #tpu.memory_space<vmem>>, vector<1x1x8x256xf32>,
    return
  }
  func.func @transform_0(%arg0: i32, %arg1: i32, %arg2: i32) -> (i32, i32, i32, i32) {
    %c0_i32 = arith.constant 0 : i32
    %c0_i32_0 = arith.constant 0 : i32
    return %arg0, %arg1, %c0_i32, %arg2 : i32, i32, i32, i32
  }
  func.func @transform_1(%arg0: i32, %arg1: i32, %arg2: i32) -> (i32, i32, i32) {
    %c0_i32 = arith.constant 0 : i32
    %c0_i32_0 = arith.constant 0 : i32
    %c0_i32_1 = arith.constant 0 : i32
    return %arg1, %c0_i32, %c0_i32_0 : i32, i32, i32
  }
  func.func @transform_2(%arg0: i32, %arg1: i32, %arg2: i32) -> (i32, i32) {
    %c0_i32 = arith.constant 0 : i32
    %c0_i32_0 = arith.constant 0 : i32
    %c0_i32_1 = arith.constant 0 : i32
    return %c0_i32, %c0_i32_0 : i32, i32
  }
  func.func @transform_3(%arg0: i32, %arg1: i32, %arg2: i32) -> (i32, i32, i32, i32) {
    %c0_i32 = arith.constant 0 : i32
    %c0_i32_0 = arith.constant 0 : i32
    return %arg0, %arg1, %c0_i32, %arg2 : i32, i32, i32, i32
  }
}

</mosaic_0001>

<bundles_post_ra>
// kernel: complex_conv_transpose2d.1
= control target key start
LH: loop header
LB: loop body
LE: loop exit
PB: predicated region body
PF: predicated region fallthrough
CT: control target
= control target key end

     0   :  { %s575_s12 = smov 0   ;;  %s577_s13 = smov 0   ;;  %s632_s0 = inlined_call_operand.vmem [shape: bf16[2,4,16,256], index: 0, kind: input, shape index: {}]   ;;  %s633_s1 = inlined_call_operand.vmem [shape: bf16[4,8,16], index: 1, kind: input, shape index: {}]   ;;  %s634_s2 = inlined_call_operand.vmem [shape: f32[8,1], index: 2, kind: input, shape index: {}]   ;;  %s635_s3 = inlined_call_operand.vmem [shape: f32[2,4,8,256], index: 3, kind: output, shape index: {}]  }
   0x1   :  { %s579_s14 = smov 0   ;;  %s581_s15 = smov 0  }
   0x2   :  { %s583_s16 = smov 0  }
   0x3 LB: > { %s28_s17 = sadd.s32 1, %s544_s14  ;;  %s32_s18 = sadd.s32 1, %s548_s15  ;;  %s552_s16 = sphi %s583_s16, %s13_s16   ;;  %s548_s15 = sphi %s581_s15, %s639_s15   ;;  %s544_s14 = sphi %s579_s14, %s638_s14   ;;  %s540_s13 = sphi %s577_s13, %s637_s13   ;;  %s536_s12 = sphi %s575_s12, %s636_s12  }
   0x4   : > { %p30_p0 = scmp.ge.s32.totalorder %s28_s17, 4  ;;  %p456_p1 = scmp.ge.s32.totalorder %s552_s16, 1 }
   0x5   : > { %p182_p2 = scmp.lt.s32.totalorder %s552_s16, 9 }
   0x6   : > { %s641_s17 = smov (%p30_p0, %s28_s17), 0  ;;  %s643_s18 = smov (!%p30_p0, %s32_s18), %s548_s15 }
   0x7   : > { %p183_p3 = pnand %p456_p1, %p182_p2  ;;  %p34_p4 = scmp.ge.s32.totalorder %s643_s18, 2 }
   0x8   : > { %p227_p5 = scmp.lt.s32.totalorder (!%p183_p3), %s540_s13, 1  ;;  %p229_p6 = scmp.lt.s32.totalorder (!%p183_p3), %s536_s12, 3  ;;  %v262_v0 = vld [vmem:[%s634_s2] sm:$0xff] (!%p183_p3)  ;;  %v554_v1 = vmov (!%p183_p3), 0   ;;  %vm278_vm0 = vcmask (!%p183_p3), 130048  }
   0x9   : > { %s645_s18 = smov (%p34_p4, %s643_s18), 0  ;;  %186 = sbr.rel (%p183_p3) target bundleno = 243 (0xf3), region = 32 }
   0xa   : > { %314 = vmatprep.mubr.bf16.mxu0 (!%p183_p3), %v554_v1  ;;  %510 = vset.pattern.permute.xlu0 (!%p183_p3), %v554_v1 }
   0xb   : > { %265 = vperm.xlu0 (!%p183_p3), %510, %v262_v0  }
  0x10   : > { %s647_s13 = smov (!%p227_p5, %s540_s13), 1  ;;  %s649_s12 = smov (!%p229_p6, %s536_s12), 3 }
  0x11   : > { %s458_s21 = sshll.u32 %s647_s13, 4  ;;  %s462_s22 = sshll.u32 %s647_s13, 3 }
  0x12   : > { %s457_s23 = sshll.u32 %s649_s12, 2  ;;  %s461_s24 = sshll.u32 %s649_s12, 1 }
  0x13   : > { %s236_s25 = sadd.s32 %s458_s21, %s457_s23  ;;  %s254_s27 = sadd.s32 %s462_s22, %s461_s24 }
  0x14   : > { %s459_s26 = sshll.u32 %s236_s25, 2  ;;  %s243_s6 = scalar_lea.vmem %s633_s1, %s457_s23 }
  0x15   : > { %s238_s30 = scalar_lea.vmem %s632_s0, %s459_s26  ;;  %v259_v4 = vld [vmem:[%s243_s6] sm:$0xf]  ;;  %s463_s7 = sshll.u32 %s254_s27, 3 }
  0x16   : > { %v511_v2 = vld [vmem:[%s238_s30 + $0x4] ss:$8 sps:$4 sm:$0xff]   ;;  %v513_v3 = vld [vmem:[%s238_s30] ss:$8 sps:$4 sm:$0xff]   ;;  %s256_s10 = scalar_lea.vmem %s635_s3, %s463_s7 }
  0x17   : > { %282 = vmatprep.subr.bf16.mxu0 %v511_v2 }
  0x18   : > { %283 = vmatpush1.bf16.msra.mxu0 %v513_v3 }
  0x1b   : > { %466 = vmatmul.mubr.msk.bf16.vlgmr.msra.gmra.mrb[0].mxu0 %vm278_vm0, %v259_v4 }
  0x8a   : > { %v266_v5 = vpop.permute.xlu0 %265 }
  0xee   : > { %v316_v6 = vpop.f32.mrb[0].mxu0 }
  0xef   : > { %v317_v7 = vadd.f32 %v316_v6, %v266_v5  ;;  %v318_v8 = vpop.f32.mrb[1].mxu0 }
  0xf0   : > { %v319_v9 = vadd.f32 %v318_v8, %v266_v5  ;;  %v320_v10 = vpop.f32.mrb[2].mxu0 }
  0xf1   : > { %323 = vst [vmem:[%s256_s10] sm:$0xff] %v317_v7  ;;  %v321_v11 = vpop.f32.mrb[3].mxu0 }
  0xf2   : > { %324 = vst [vmem:[%s256_s10 + $0x8] sm:$0xff] %v319_v9 }
  0xf3 PF: > { %s13_s16 = sadd.s32 1, %s552_s16   ;;  %s636_s12 = smov %s544_s14 }
  0xf4   : > { %p10_p7 = scmp.ge.s32.totalorder %s13_s16, 10   ;;  %s637_s13 = smov %s548_s15 }
  0xf5   : > { %s638_s14 = smov %s641_s17  ;;  %s639_s15 = smov %s645_s18 }
  0xf6   :  { %12 = sbr.rel (!%p10_p7) target bundleno = 3 (0x3), region = 65 }

</bundles_post_ra>
